<compile_context>
chip_gen: v6e
topology: v6e:2x2x1
jax: 0.10.0
libtpu: 0.0.40
codegen_flags: <defaults>
</compile_context>

<pallas_src>
import jax
import jax.numpy as jnp
from jax.experimental import pallas as pl
from jax.experimental.pallas import tpu as pltpu


def _copy_kernel(x_ref, o_ref):
    # Identity copy of one (batch, TILE_F) tile.
    o_ref[...] = x_ref[...]


_LANE = 128
_TILE_TARGET_BYTES = 2 * 1024 * 1024  # ~2 MiB per block: 4x buffers = 8 MiB,
                                       # safe under every chip's scoped VMEM.


def _pick_feature_tile(feat, batch, dtype_bytes):
    """Largest multiple-of-128 divisor of `feat` whose (batch, tile) block is
    at most ~_TILE_TARGET_BYTES. Falls back to the full feature width when
    `feat` is not lane-aligned (legal: block dim == full array dim)."""
    if feat % _LANE != 0:
        return feat
    max_lanes = max(_LANE, _TILE_TARGET_BYTES // max(1, batch * dtype_bytes))
    tile = min((max_lanes // _LANE) * _LANE, feat)
    while feat % tile != 0:
        tile -= _LANE
    return tile


def reshape_forward(x, target_shape):
    """Pallas equivalent of Reshape(shape=target_shape).forward(x).

    x: array of shape (B, ...) — any trailing dims (e.g. NCHW).
    target_shape: tuple of ints (the per-example target shape).
    Returns array of shape (B, *target_shape), same dtype as x.
    """
    b = x.shape[0]
    feat = 1
    for d in x.shape[1:]:
        feat *= d

    tgt_feat = 1
    for d in target_shape:
        tgt_feat *= d
    assert feat == tgt_feat, "reshape size mismatch"

    # Flatten per-example dims (row-major, same as torch .view on contiguous x).
    # This is metadata-only in XLA.
    x_flat = jnp.reshape(x, (b, feat))

    tile_f = _pick_feature_tile(feat, b, x.dtype.itemsize)
    grid = (feat // tile_f,) if feat % tile_f == 0 else (1,)
    if grid == (1,):
        tile_f = feat  # non-lane-aligned fallback: single full block

    out_flat = pl.pallas_call(
        _copy_kernel,
        out_shape=jax.ShapeDtypeStruct((b, feat), x.dtype),
        grid=grid,
        in_specs=[pl.BlockSpec((b, tile_f), lambda i: (0, i))],
        out_specs=pl.BlockSpec((b, tile_f), lambda i: (0, i)),
        # Let XLA reuse the input buffer for the output when possible.
        input_output_aliases={0: 0},
        compiler_params=pltpu.CompilerParams(
            # Independent copy tiles -> shard across TensorCores (v7x megacore).
            dimension_semantics=("parallel",),
            vmem_limit_bytes=32 * 1024 * 1024,
        ),
    )(x_flat)

    # Final shape change is metadata-only.
    return jnp.reshape(out_flat, (b, *target_shape))


if __name__ == "__main__":
    key = jax.random.PRNGKey(0)
    # Small NCHW input consistent with how Reshape is used inside a conv model.
    B, C, H, W = 2, 4, 16, 16
    x = jax.random.normal(key, (B, C, H, W), dtype=jnp.float32)

    # Reshape(shape=[16, 64]): x.view(B, 16, 64)
    target_shape = (16, 64)

    # Reference semantics (== torch .view on contiguous input), computed first.
    y_ref = jnp.reshape(x, (B, *target_shape))
    y_ref = jax.block_until_ready(y_ref)

    y = reshape_forward(x, target_shape)
    y = jax.block_until_ready(y)

    assert y.shape == (B, *target_shape)
    assert y.dtype == x.dtype
    assert bool(jnp.array_equal(y, y_ref))

    print("KERNEL_OK")
</pallas_src>

<mosaic_0001>
module attributes {stable_mosaic.version = 11 : i64} {
  func.func @_copy_kernel(%arg0: i32, %arg1: memref<2x1024xf32, #tpu.memory_space<vmem>>, %arg2: memref<2x1024xf32, #tpu.memory_space<vmem>>) attributes {dimension_semantics = [#tpu.dimension_semantics<parallel>], iteration_bounds = array<i64: 1>, scalar_prefetch = 0 : i64, scratch_operands = 0 : i64, tpu.core_type = #tpu.core_type<tc>, window_params = [{transform_indices = @transform_0, window_bounds = array<i64: 2, 1024>}, {transform_indices = @transform_1, window_bounds = array<i64: 2, 1024>}]} {
    %c0 = arith.constant 0 : index
    %c0_0 = arith.constant 0 : index
    %0 = vector.load %arg1[%c0, %c0_0] : memref<2x1024xf32, #tpu.memory_space<vmem>>, vector<2x1024xf32>
    %c0_1 = arith.constant 0 : index
    %c0_2 = arith.constant 0 : index
    %1 = vector.load %arg2[%c0_1, %c0_2] : memref<2x1024xf32, #tpu.memory_space<vmem>>, vector<2x1024xf32>
    tpu.vector_store %arg2[%c0_1, %c0_2], %0 {strides = array<i32>} : memref<2x1024xf32, #tpu.memory_space<vmem>>, vector<2x1024xf32>,
    return
  }
  func.func @transform_0(%arg0: i32) -> (i32, i32) {
    %c0_i32 = arith.constant 0 : i32
    %c0_i32_0 = arith.constant 0 : i32
    return %c0_i32, %arg0 : i32, i32
  }
  func.func @transform_1(%arg0: i32) -> (i32, i32) {
    %c0_i32 = arith.constant 0 : i32
    %c0_i32_0 = arith.constant 0 : i32
    return %c0_i32, %arg0 : i32, i32
  }
}

</mosaic_0001>

<bundles_post_ra>
// kernel: tpu_custom_call.1
= control target key start
LH: loop header
LB: loop body
LE: loop exit
PB: predicated region body
PF: predicated region fallthrough
CT: control target
= control target key end

     0   :  { %6 = vsyncpa [#allocation3], 0  ;;  %s104_s0 = inlined_call_operand.hbm [shape: f32[2,1024], index: 0, kind: input, shape index: {}, may-alias: {0,1}]   ;;  %s105_s1 = inlined_call_operand.hbm [shape: f32[2,1024], index: 1, kind: output, shape index: {}, may-alias: {0,1}]  }
   0x1   :  { %7 = vsyncpa [#allocation4], 0  ;;  %s86_s6 = smov [#allocation2]  }
   0x2   :  { %s14_s7 = sshll.u32 %s86_s6, 4  ;;  %s15_s7 = int_to_ptr.vmem [resolvable:$true] %s14_s7 }
   0x3   :  { %s50_s8 = scalar_lea.vmem %s15_s7, 256  ;;  %p55_p1 = scmp.lt.s32.totalorder %s15_s7, %s15_s7 }
   0x4   :  { %p51_p0 = scmp.ne.s32.totalorder %s15_s7, %s50_s8  ;;  %p56_p2 = scmp.lt.s32.totalorder %s50_s8, %s50_s8 }
   0x6   :  { %p57_p3 = por %p56_p2, %p55_p1 }
   0x8   :  { %p58_p4 = pnand %p57_p3, %p51_p0 }
   0xa   :  { %61 = shalt.err (!%p58_p4)
}
   0xb   :  { %17 = dma.hbm_to_vmem [thread:$0]  %s104_s0, 256, %s15_s7, [#allocation3]  }
   0xc   :  { %82 = dma.done.wait [#allocation3], 256  }
   0xd   :  { %83 = vsyncadd [#allocation3], 4294967040  ;;  %s87_s11 = smov [#allocation5]   ;;  %v21_v0 = vld [vmem:[#allocation2] sm:$0xff]  ;;  %v22_v1 = vld [vmem:[#allocation2 + $0x8] sm:$0xff] }
   0xe   :  { %s31_s12 = sshll.u32 %s87_s11, 4  ;;  %23 = vst [vmem:[#allocation5] sm:$0xff] %v21_v0  ;;  %24 = vst [vmem:[#allocation5 + $0x8] sm:$0xff] %v22_v1  ;;  %s32_s12 = int_to_ptr.vmem [resolvable:$true] %s31_s12 }
   0xf   :  { %s62_s13 = scalar_lea.vmem %s32_s12, 256  ;;  %p67_p6 = scmp.lt.s32.totalorder %s32_s12, %s32_s12 }
  0x10   :  { %p63_p5 = scmp.ne.s32.totalorder %s32_s12, %s62_s13  ;;  %p68_p7 = scmp.lt.s32.totalorder %s62_s13, %s62_s13 }
  0x12   :  { %p69_p8 = por %p68_p7, %p67_p6 }
  0x14   :  { %p70_p9 = pnand %p69_p8, %p63_p5 }
  0x16   :  { %73 = shalt.err (!%p70_p9)
}
  0x17   :  { %34 = dma.vmem_to_hbm [thread:$0]  %s32_s12, 256, %s105_s1, [#allocation4]  }
  0x18   :  { %84 = dma.done.wait [#allocation4], 256  }
  0x19   :  { %85 = vsyncadd [#allocation4], 4294967040 }
  0x1a   :  { %38 = vsyncpa [#allocation3], 1 }
  0x1b   :  { %39 = vsyncpa [#allocation4], 1 }

</bundles_post_ra>
